<compile_context>
chip_gen: v7x
topology: tpu7x:2x2x1
jax: 0.10.0
libtpu: 0.0.40
codegen_flags: <defaults>
</compile_context>

<pallas_src>
import jax
import jax.numpy as jnp
from jax.experimental import pallas as pl
from jax.experimental.pallas import tpu as pltpu


def _round_up(x, m):
    return (x + m - 1) // m * m


# ---------------------------------------------------------------------------
# Kernel: one batch tile of the fused two-head MLP.
# ---------------------------------------------------------------------------
def _qnet_kernel(s_ref, a_ref,
                 wis_ref, wia_ref, bi_ref,
                 wm_ref, bm_ref,
                 wo_ref, bo_ref,
                 q_ref):
    # Inputs arrive as f32; cast to bf16 in-kernel (VPU pack, hides under MXU).
    s = s_ref[...].astype(wis_ref.dtype)
    a = a_ref[...].astype(wia_ref.dtype)

    # Layer 1 (both heads fused along the lane dim; concat-free):
    #   h = relu(state @ W_in_state + action @ W_in_action + b_in)
    h = jnp.dot(s, wis_ref[...], preferred_element_type=jnp.float32)
    h = h + jnp.dot(a, wia_ref[...], preferred_element_type=jnp.float32)
    h = jnp.maximum(h + bi_ref[...], 0.0)

    # Layer 2: block-diagonal fused weight keeps the two heads independent.
    h2 = jnp.dot(h.astype(wm_ref.dtype), wm_ref[...],
                 preferred_element_type=jnp.float32)
    h2 = jnp.maximum(h2 + bm_ref[...], 0.0)

    # Layer 3: one (TB, 2) output tile — column 0 is q1, column 1 is q2.
    # (Kept on the MXU; a VPU-mul + XLU-reduce epilogue is a possible micro-opt
    #  but only worth it if the bundle shows the N=2 pop / masked vst binding.)
    q = jnp.dot(h2.astype(wo_ref.dtype), wo_ref[...],
                preferred_element_type=jnp.float32)
    q_ref[...] = (q + bo_ref[...]).astype(q_ref.dtype)


# ---------------------------------------------------------------------------
# Parameter packing: PyTorch-style per-layer params -> fused, 128-padded packs.
# ---------------------------------------------------------------------------
def pack_params(params, num_inputs, num_actions, hidden_dim,
                compute_dtype=jnp.bfloat16):
    H = hidden_dim
    D = num_inputs + num_actions
    # Hp = 128 for H <= 64: the minimum lane-dense width.  Deliberately NOT
    # padded to 256 — the kernel is overhead/DMA bound, not MXU bound.
    Hp = max(128, _round_up(2 * H, 128))

    w_in = jnp.zeros((D, Hp), jnp.float32)
    w_in = w_in.at[:, :H].set(params["w1"]).at[:, H:2 * H].set(params["w4"])
    b_in = jnp.zeros((1, Hp), jnp.float32)
    b_in = b_in.at[:, :H].set(params["b1"]).at[:, H:2 * H].set(params["b4"])

    w_mid = jnp.zeros((Hp, Hp), jnp.float32)       # block-diagonal, zero pad
    w_mid = w_mid.at[:H, :H].set(params["w2"]).at[H:2 * H, H:2 * H].set(params["w5"])
    b_mid = jnp.zeros((1, Hp), jnp.float32)
    b_mid = b_mid.at[:, :H].set(params["b2"]).at[:, H:2 * H].set(params["b5"])

    w_out = jnp.zeros((Hp, 2), jnp.float32)
    w_out = w_out.at[:H, 0:1].set(params["w3"]).at[H:2 * H, 1:2].set(params["w6"])
    b_out = jnp.concatenate([params["b3"], params["b6"]], axis=1)  # (1, 2)

    return {
        # split the first-layer weight by rows so no state/action concat is needed
        "w_in_s": w_in[:num_inputs].astype(compute_dtype),
        "w_in_a": w_in[num_inputs:].astype(compute_dtype),
        "b_in": b_in,                      # biases stay f32 (post-accumulation add)
        "w_mid": w_mid.astype(compute_dtype),
        "b_mid": b_mid,
        "w_out": w_out.astype(compute_dtype),
        "b_out": b_out,
    }


# ---------------------------------------------------------------------------
# Wrapper
# ---------------------------------------------------------------------------
def qnetwork_forward(state, action, packed, *, block_b=4096, min_grid_steps=1):
    """min_grid_steps: set to 2 on v7x (2 TensorCores) so the parallel batch
    axis has work for both cores; leave at 1 on single-TC v5e/v6e where every
    extra grid step is pure serial overhead."""
    B, num_inputs = state.shape
    _, num_actions = action.shape
    D = num_inputs + num_actions
    Hp = packed["w_mid"].shape[0]

    # Tile sizing: fewest, fattest tiles (per-step overhead dominates compute).
    align = 16 if B >= 16 else 8           # 16 for bf16-safe packing; 8 ok for f32
    steps = max(min_grid_steps, pl.cdiv(B, block_b))
    TB = min(block_b, _round_up(pl.cdiv(B, steps), align))
    grid = (pl.cdiv(B, TB),)

    def batch_map(i):
        return (i, 0)

    def pinned(i):       # weights/biases stay VMEM-resident across grid steps
        return (0, 0)

    in_specs = [
        pl.BlockSpec((TB, num_inputs), batch_map),
        pl.BlockSpec((TB, num_actions), batch_map),
        pl.BlockSpec((num_inputs, Hp), pinned),
        pl.BlockSpec((num_actions, Hp), pinned),
        pl.BlockSpec((1, Hp), pinned),
        pl.BlockSpec((Hp, Hp), pinned),
        pl.BlockSpec((1, Hp), pinned),
        pl.BlockSpec((Hp, 2), pinned),
        pl.BlockSpec((1, 2), pinned),
    ]
    out_spec = pl.BlockSpec((TB, 2), batch_map)

    weight_bytes = sum(int(v.size) * v.dtype.itemsize for v in packed.values())

    # Cost hint: f32 inputs (no wrapper cast), f32 outputs, fused weights once.
    flops = 2 * B * Hp * (D + Hp + 2)
    bytes_accessed = B * D * 4 + B * 2 * 4 + weight_bytes

    # VMEM footprint at this TB: double-buffered f32 inputs/outputs +
    # f32 intermediates (h, h2) + pinned weights, with 2x headroom,
    # clamped below v7x's 64 MiB physical VMEM.
    footprint = (2 * TB * D * 4            # inputs (double-buffered)
                 + 2 * TB * 2 * 4          # output (double-buffered)
                 + 2 * TB * Hp * 4         # h, h2 intermediates
                 + weight_bytes)
    vmem_limit = int(min(48 * 1024 * 1024, max(16 * 1024 * 1024, 2 * footprint)))

    q = pl.pallas_call(
        _qnet_kernel,
        out_shape=jax.ShapeDtypeStruct((B, 2), jnp.float32),
        grid=grid,
        in_specs=in_specs,
        out_specs=out_spec,
        compiler_params=pltpu.CompilerParams(
            dimension_semantics=("parallel",),       # shards batch across TCs on v7x
            vmem_limit_bytes=vmem_limit,
        ),
        cost_estimate=pl.CostEstimate(
            flops=flops, transcendentals=0, bytes_accessed=bytes_accessed),
    )(state, action,
      packed["w_in_s"], packed["w_in_a"], packed["b_in"],
      packed["w_mid"], packed["b_mid"],
      packed["w_out"], packed["b_out"])

    # Split the fused (B, 2) result back into the module's two outputs.
    return q[:, 0:1], q[:, 1:2]


# ---------------------------------------------------------------------------
# Init + pure-JAX reference
# ---------------------------------------------------------------------------
def init_params(key, num_inputs, num_actions, hidden_dim):
    """Deterministic synthetic init (xavier-uniform weights, zero biases),
    matching the shapes implied by the PyTorch module. Weights stored as
    (in_features, out_features)."""
    D = num_inputs + num_actions
    H = hidden_dim

    def xavier(k, fan_in, fan_out):
        limit = jnp.sqrt(6.0 / (fan_in + fan_out))
        return jax.random.uniform(k, (fan_in, fan_out), jnp.float32, -limit, limit)

    ks = jax.random.split(key, 6)
    return {
        "w1": xavier(ks[0], D, H), "b1": jnp.zeros((1, H), jnp.float32),
        "w2": xavier(ks[1], H, H), "b2": jnp.zeros((1, H), jnp.float32),
        "w3": xavier(ks[2], H, 1), "b3": jnp.zeros((1, 1), jnp.float32),
        "w4": xavier(ks[3], D, H), "b4": jnp.zeros((1, H), jnp.float32),
        "w5": xavier(ks[4], H, H), "b5": jnp.zeros((1, H), jnp.float32),
        "w6": xavier(ks[5], H, 1), "b6": jnp.zeros((1, 1), jnp.float32),
    }


def _reference_forward(state, action, params):
    xu = jnp.concatenate([state, action], axis=1)
    x1 = jax.nn.relu(xu @ params["w1"] + params["b1"])
    x11 = jax.nn.relu(x1 @ params["w2"] + params["b2"])
    q1 = x11 @ params["w3"] + params["b3"]
    x2 = jax.nn.relu(xu @ params["w4"] + params["b4"])
    x22 = jax.nn.relu(x2 @ params["w5"] + params["b5"])
    q2 = x22 @ params["w6"] + params["b6"]
    return q1, q2


if __name__ == "__main__":
    # Small shapes consistent with the module: B=8, num_inputs=16, num_actions=4, hidden=32.
    B, num_inputs, num_actions, hidden_dim = 8, 16, 4, 32

    key = jax.random.PRNGKey(0)
    k_state, k_action, k_params = jax.random.split(key, 3)

    state = jax.random.normal(k_state, (B, num_inputs), jnp.float32)
    action = jax.random.normal(k_action, (B, num_actions), jnp.float32)
    params = init_params(k_params, num_inputs, num_actions, hidden_dim)
    packed = pack_params(params, num_inputs, num_actions, hidden_dim)

    q1, q2 = qnetwork_forward(state, action, packed)
    jax.block_until_ready((q1, q2))

    # Sanity check vs f32 reference (kernel uses bf16 matmuls with f32 accumulation,
    # so tolerance is relaxed accordingly).
    r1, r2 = _reference_forward(state, action, params)
    assert q1.shape == (B, 1) and q2.shape == (B, 1)
    assert jnp.allclose(q1, r1, atol=5e-2, rtol=5e-2), "head-1 mismatch"
    assert jnp.allclose(q2, r2, atol=5e-2, rtol=5e-2), "head-2 mismatch"

    print("KERNEL_OK")
</pallas_src>

<mosaic_0001>
module attributes {stable_mosaic.version = 11 : i64} {
  func.func @_qnet_kernel(%arg0: i32, %arg1: memref<8x16xf32, #tpu.memory_space<vmem>>, %arg2: memref<8x4xf32, #tpu.memory_space<vmem>>, %arg3: memref<16x128xbf16, #tpu.memory_space<vmem>>, %arg4: memref<4x128xbf16, #tpu.memory_space<vmem>>, %arg5: memref<1x128xf32, #tpu.memory_space<vmem>>, %arg6: memref<128x128xbf16, #tpu.memory_space<vmem>>, %arg7: memref<1x128xf32, #tpu.memory_space<vmem>>, %arg8: memref<128x2xbf16, #tpu.memory_space<vmem>>, %arg9: memref<1x2xf32, #tpu.memory_space<vmem>>, %arg10: memref<8x2xf32, #tpu.memory_space<vmem>>) attributes {dimension_semantics = [#tpu.dimension_semantics<parallel>], iteration_bounds = array<i64: 1>, scalar_prefetch = 0 : i64, scratch_operands = 0 : i64, tpu.core_type = #tpu.core_type<tc>, window_params = [{transform_indices = @transform_0, window_bounds = array<i64: 8, 16>}, {transform_indices = @transform_1, window_bounds = array<i64: 8, 4>}, {pipeline_mode = #tpu.pipeline_mode<synchronous>, transform_indices = @transform_2, window_bounds = array<i64: 16, 128>}, {pipeline_mode = #tpu.pipeline_mode<synchronous>, transform_indices = @transform_3, window_bounds = array<i64: 4, 128>}, {pipeline_mode = #tpu.pipeline_mode<synchronous>, transform_indices = @transform_4, window_bounds = array<i64: 1, 128>}, {pipeline_mode = #tpu.pipeline_mode<synchronous>, transform_indices = @transform_5, window_bounds = array<i64: 128, 128>}, {pipeline_mode = #tpu.pipeline_mode<synchronous>, transform_indices = @transform_6, window_bounds = array<i64: 1, 128>}, {pipeline_mode = #tpu.pipeline_mode<synchronous>, transform_indices = @transform_7, window_bounds = array<i64: 128, 2>}, {pipeline_mode = #tpu.pipeline_mode<synchronous>, transform_indices = @transform_8, window_bounds = array<i64: 1, 2>}, {transform_indices = @transform_9, window_bounds = array<i64: 8, 2>}]} {
    %c0 = arith.constant 0 : index
    %c0_0 = arith.constant 0 : index
    %0 = vector.load %arg1[%c0, %c0_0] : memref<8x16xf32, #tpu.memory_space<vmem>>, vector<8x16xf32>
    %1 = arith.truncf %0 : vector<8x16xf32> to vector<8x16xbf16>
    %c0_1 = arith.constant 0 : index
    %c0_2 = arith.constant 0 : index
    %2 = vector.load %arg2[%c0_1, %c0_2] : memref<8x4xf32, #tpu.memory_space<vmem>>, vector<8x4xf32>
    %3 = arith.truncf %2 : vector<8x4xf32> to vector<8x4xbf16>
    %c0_3 = arith.constant 0 : index
    %c0_4 = arith.constant 0 : index
    %4 = vector.load %arg3[%c0_3, %c0_4] : memref<16x128xbf16, #tpu.memory_space<vmem>>, vector<16x128xbf16>
    %cst = arith.constant dense<0.000000e+00> : vector<8x128xf32>
    %5 = tpu.matmul %1, %4, %cst {dimension_numbers = #tpu.dot_dimension_numbers<[1], [0], [0], [1], [0, 0, 1, 1], [], []>} : vector<8x16xbf16>, vector<16x128xbf16>, vector<8x128xf32> -> vector<8x128xf32>
    %c0_5 = arith.constant 0 : index
    %c0_6 = arith.constant 0 : index
    %6 = vector.load %arg4[%c0_5, %c0_6] : memref<4x128xbf16, #tpu.memory_space<vmem>>, vector<4x128xbf16>
    %cst_7 = arith.constant dense<0.000000e+00> : vector<8x128xf32>
    %7 = tpu.matmul %3, %6, %cst_7 {dimension_numbers = #tpu.dot_dimension_numbers<[1], [0], [0], [1], [0, 0, 1, 1], [], []>} : vector<8x4xbf16>, vector<4x128xbf16>, vector<8x128xf32> -> vector<8x128xf32>
    %8 = arith.addf %5, %7 : vector<8x128xf32>
    %c0_8 = arith.constant 0 : index
    %c0_9 = arith.constant 0 : index
    %9 = vector.load %arg5[%c0_8, %c0_9] : memref<1x128xf32, #tpu.memory_space<vmem>>, vector<1x128xf32>
    %10 = vector.broadcast %9 : vector<1x128xf32> to vector<8x128xf32>
    %11 = arith.addf %8, %10 : vector<8x128xf32>
    %cst_10 = arith.constant 0.000000e+00 : f32
    %12 = vector.broadcast %cst_10 : f32 to vector<8x128xf32>
    %13 = arith.maximumf %11, %12 : vector<8x128xf32>
    %14 = arith.truncf %13 : vector<8x128xf32> to vector<8x128xbf16>
    %c0_11 = arith.constant 0 : index
    %c0_12 = arith.constant 0 : index
    %15 = vector.load %arg6[%c0_11, %c0_12] : memref<128x128xbf16, #tpu.memory_space<vmem>>, vector<128x128xbf16>
    %cst_13 = arith.constant dense<0.000000e+00> : vector<8x128xf32>
    %16 = tpu.matmul %14, %15, %cst_13 {dimension_numbers = #tpu.dot_dimension_numbers<[1], [0], [0], [1], [0, 0, 1, 1], [], []>} : vector<8x128xbf16>, vector<128x128xbf16>, vector<8x128xf32> -> vector<8x128xf32>
    %c0_14 = arith.constant 0 : index
    %c0_15 = arith.constant 0 : index
    %17 = vector.load %arg7[%c0_14, %c0_15] : memref<1x128xf32, #tpu.memory_space<vmem>>, vector<1x128xf32>
    %18 = vector.broadcast %17 : vector<1x128xf32> to vector<8x128xf32>
    %19 = arith.addf %16, %18 : vector<8x128xf32>
    %cst_16 = arith.constant 0.000000e+00 : f32
    %20 = vector.broadcast %cst_16 : f32 to vector<8x128xf32>
    %21 = arith.maximumf %19, %20 : vector<8x128xf32>
    %22 = arith.truncf %21 : vector<8x128xf32> to vector<8x128xbf16>
    %c0_17 = arith.constant 0 : index
    %c0_18 = arith.constant 0 : index
    %23 = vector.load %arg8[%c0_17, %c0_18] : memref<128x2xbf16, #tpu.memory_space<vmem>>, vector<128x2xbf16>
    %cst_19 = arith.constant dense<0.000000e+00> : vector<8x2xf32>
    %24 = tpu.matmul %22, %23, %cst_19 {dimension_numbers = #tpu.dot_dimension_numbers<[1], [0], [0], [1], [0, 0, 1, 1], [], []>} : vector<8x128xbf16>, vector<128x2xbf16>, vector<8x2xf32> -> vector<8x2xf32>
    %c0_20 = arith.constant 0 : index
    %c0_21 = arith.constant 0 : index
    %25 = vector.load %arg9[%c0_20, %c0_21] : memref<1x2xf32, #tpu.memory_space<vmem>>, vector<1x2xf32>
    %26 = vector.broadcast %25 : vector<1x2xf32> to vector<8x2xf32>
    %27 = arith.addf %24, %26 : vector<8x2xf32>
    %c0_22 = arith.constant 0 : index
    %c0_23 = arith.constant 0 : index
    %28 = vector.load %arg10[%c0_22, %c0_23] : memref<8x2xf32, #tpu.memory_space<vmem>>, vector<8x2xf32>
    tpu.vector_store %arg10[%c0_22, %c0_23], %27 {strides = array<i32>} : memref<8x2xf32, #tpu.memory_space<vmem>>, vector<8x2xf32>,
    return
  }
  func.func @transform_0(%arg0: i32) -> (i32, i32) {
    %c0_i32 = arith.constant 0 : i32
    %c0_i32_0 = arith.constant 0 : i32
    return %arg0, %c0_i32 : i32, i32
  }
  func.func @transform_1(%arg0: i32) -> (i32, i32) {
    %c0_i32 = arith.constant 0 : i32
    %c0_i32_0 = arith.constant 0 : i32
    return %arg0, %c0_i32 : i32, i32
  }
  func.func @transform_2(%arg0: i32) -> (i32, i32) {
    %c0_i32 = arith.constant 0 : i32
    %c0_i32_0 = arith.constant 0 : i32
    %c0_i32_1 = arith.constant 0 : i32
    return %c0_i32, %c0_i32_0 : i32, i32
  }
  func.func @transform_3(%arg0: i32) -> (i32, i32) {
    %c0_i32 = arith.constant 0 : i32
    %c0_i32_0 = arith.constant 0 : i32
    %c0_i32_1 = arith.constant 0 : i32
    return %c0_i32, %c0_i32_0 : i32, i32
  }
  func.func @transform_4(%arg0: i32) -> (i32, i32) {
    %c0_i32 = arith.constant 0 : i32
    %c0_i32_0 = arith.constant 0 : i32
    %c0_i32_1 = arith.constant 0 : i32
    return %c0_i32, %c0_i32_0 : i32, i32
  }
  func.func @transform_5(%arg0: i32) -> (i32, i32) {
    %c0_i32 = arith.constant 0 : i32
    %c0_i32_0 = arith.constant 0 : i32
    %c0_i32_1 = arith.constant 0 : i32
    return %c0_i32, %c0_i32_0 : i32, i32
  }
  func.func @transform_6(%arg0: i32) -> (i32, i32) {
    %c0_i32 = arith.constant 0 : i32
    %c0_i32_0 = arith.constant 0 : i32
    %c0_i32_1 = arith.constant 0 : i32
    return %c0_i32, %c0_i32_0 : i32, i32
  }
  func.func @transform_7(%arg0: i32) -> (i32, i32) {
    %c0_i32 = arith.constant 0 : i32
    %c0_i32_0 = arith.constant 0 : i32
    %c0_i32_1 = arith.constant 0 : i32
    return %c0_i32, %c0_i32_0 : i32, i32
  }
  func.func @transform_8(%arg0: i32) -> (i32, i32) {
    %c0_i32 = arith.constant 0 : i32
    %c0_i32_0 = arith.constant 0 : i32
    %c0_i32_1 = arith.constant 0 : i32
    return %c0_i32, %c0_i32_0 : i32, i32
  }
  func.func @transform_9(%arg0: i32) -> (i32, i32) {
    %c0_i32 = arith.constant 0 : i32
    %c0_i32_0 = arith.constant 0 : i32
    return %arg0, %c0_i32 : i32, i32
  }
}

</mosaic_0001>

<bundles_post_ra>
// kernel: tpu_custom_call.1
= control target key start
LH: loop header
LB: loop body
LE: loop exit
PB: predicated region body
PF: predicated region fallthrough
CT: control target
= control target key end

     0   :  { %vm44_vm0 = vcmask 1041408   ;;  %v493_v0 = vmov 0.0   ;;  %vm494_vm1 = vmmov 0   ;;  %vm40_vm2 = vcmask 31744   ;;  %s643_s3 = inlined_call_operand.vmem [shape: bf16[4,128], index: 3, kind: input, shape index: {}]   ;;  %s644_s2 = inlined_call_operand.vmem [shape: bf16[16,128], index: 2, kind: input, shape index: {}]   ;;  %s645_s1 = inlined_call_operand.vmem [shape: f32[8,4], index: 1, kind: input, shape index: {}]   ;;  %s646_s0 = inlined_call_operand.vmem [shape: f32[8,16], index: 0, kind: input, shape index: {}]   ;;  %s647_s5 = inlined_call_operand.vmem [shape: bf16[128,128], index: 5, kind: input, shape index: {}]   ;;  %s648_s7 = inlined_call_operand.vmem [shape: bf16[128,2], index: 7, kind: input, shape index: {}]   ;;  %s649_s4 = inlined_call_operand.vmem [shape: f32[1,128], index: 4, kind: input, shape index: {}]   ;;  %s650_s6 = inlined_call_operand.vmem [shape: f32[1,128], index: 6, kind: input, shape index: {}]   ;;  %s651_s8 = inlined_call_operand.vmem [shape: f32[1,2], index: 8, kind: input, shape index: {}]   ;;  %s652_s9 = inlined_call_operand.vmem [shape: f32[8,2], index: 9, kind: output, shape index: {}]  }
   0x1   :  { %422 = vmatprep.subr.bf16.mxu0 %v493_v0  ;;  %v39_v1 = vld [vmem:[%s643_s3] sm:$0x3]  ;;  %428 = vmatprep.subr.bf16.mxu1 %v493_v0  ;;  %vm94_vm3 = vcmask 130048   ;;  %v478_v9 = vld [vmem:[%s647_s5 + $0x8] sm:$0xff]   ;;  %v479_v10 = vld [vmem:[%s647_s5 + $0x10] sm:$0xff]   ;;  %vm372_vm4 = vcmask 15360  }
   0x2   :  { %v46_v2 = vsel %vm44_vm0, %v39_v1, 0  ;;  %v476_v3 = vld [vmem:[%s644_s2] sm:$0xff]   ;;  %424 = vmatprep.mubr.msk.bf16.mxu0 %vm494_vm1, %v493_v0  ;;  %430 = vmatprep.mubr.msk.bf16.mxu1 %vm494_vm1, %v493_v0  ;;  %v480_v11 = vld [vmem:[%s647_s5 + $0x18] sm:$0xff]   ;;  %v482_v13 = vld [vmem:[%s647_s5 + $0x28] sm:$0xff]  }
   0x3   :  { %v35_v4 = vld [vmem:[%s645_s1] sm:$0xff]  ;;  %423 = vmatpush3.bf16.msra.mxu0 %v46_v2  ;;  %429 = vmatpush3.bf16.msra.mxu1 %v476_v3  ;;  %v483_v14 = vld [vmem:[%s647_s5 + $0x30] sm:$0xff]   ;;  %v484_v15 = vld [vmem:[%s647_s5 + $0x38] sm:$0xff]  }
   0x4   :  { %v33_v5 = vld [vmem:[%s646_s0] sm:$0xff]  ;;  %v36_v6 = vpack.c.bf16 %v35_v4, %v35_v4  ;;  %434 = vmatprep.subr.bf16.mxu0 %v493_v0  ;;  %454 = vmatprep.subr.bf16.mxu1 %v493_v0  ;;  %v486_v17 = vld [vmem:[%s648_s7 + $0x8] sm:$0xff]   ;;  %v487_v18 = vld [vmem:[%s648_s7 + $0x10] sm:$0xff]  }
   0x5   :  { %v34_v7 = vpack.c.bf16 %v33_v5, %v33_v5  ;;  %v477_v8 = vld [vmem:[%s647_s5] sm:$0xff]   ;;  %v488_v19 = vld [vmem:[%s648_s7 + $0x18] sm:$0xff]   ;;  %v490_v21 = vld [vmem:[%s648_s7 + $0x28] sm:$0xff]  }
   0x6   :  { %425 = vmatmul.mubr.msk.bf16.vlgmr.msra.gmra.mrb[0].mxu0 %vm40_vm2, %v36_v6  ;;  %v481_v12 = vld [vmem:[%s647_s5 + $0x20] sm:$0xff]   ;;  %v491_v35 = vld [vmem:[%s648_s7 + $0x30] sm:$0xff]   ;;  %v492_v36 = vld [vmem:[%s648_s7 + $0x38] sm:$0xff]  }
   0x7   :  { %431 = vmatmul.mubr.msk.bf16.vlgmr.msra.gmra.mrb[0].mxu1 %vm94_vm3, %v34_v7  ;;  %435 = vmatpush3.bf16.msra.mxu0 %v477_v8  ;;  %v485_v16 = vld [vmem:[%s648_s7] sm:$0xff]  }
   0x8   :  { %436 = vmatprep.subr.bf16.mxu0 %v493_v0  ;;  %450 = vmatprep.mubr.msk.bf16.mxu0 %vm494_vm1, %v493_v0  ;;  %v489_v20 = vld [vmem:[%s648_s7 + $0x20] sm:$0xff]  }
   0x9   :  { %470 = vmatprep.mubr.msk.bf16.mxu1 %vm494_vm1, %v493_v0  ;;  %455 = vmatpush3.bf16.msra.mxu1 %v485_v16  ;;  %v381_v25 = vld [vmem:[%s649_s4] ss:$0 sm:$0xff] }
   0xa   :  { %456 = vmatprep.subr.bf16.mxu1 %v493_v0  ;;  %v382_v37 = vld [vmem:[%s650_s6] ss:$0 sm:$0xff] }
   0xb   :  { %437 = vmatpush3.bf16.msra.mxu0 %v478_v9  ;;  %v391_v45 = vld [vmem:[%s651_s8] ss:$0 sm:$0xff] }
   0xc   :  { %438 = vmatprep.subr.bf16.mxu0 %v493_v0 }
   0xd   :  { %457 = vmatpush3.bf16.msra.mxu1 %v486_v17 }
   0xe   :  { %458 = vmatprep.subr.bf16.mxu1 %v493_v0 }
   0xf   :  { %439 = vmatpush3.bf16.msra.mxu0 %v479_v10 }
  0x10   :  { %440 = vmatprep.subr.bf16.mxu0 %v493_v0 }
  0x11   :  { %459 = vmatpush3.bf16.msra.mxu1 %v487_v18 }
  0x12   :  { %460 = vmatprep.subr.bf16.mxu1 %v493_v0 }
  0x13   :  { %441 = vmatpush3.bf16.msra.mxu0 %v480_v11 }
  0x14   :  { %442 = vmatprep.subr.bf16.mxu0 %v493_v0 }
  0x15   :  { %461 = vmatpush3.bf16.msra.mxu1 %v488_v19 }
  0x16   :  { %462 = vmatprep.subr.bf16.mxu1 %v493_v0 }
  0x17   :  { %443 = vmatpush3.bf16.msra.mxu0 %v481_v12 }
  0x18   :  { %444 = vmatprep.subr.bf16.mxu0 %v493_v0 }
  0x19   :  { %463 = vmatpush3.bf16.msra.mxu1 %v489_v20 }
  0x1a   :  { %464 = vmatprep.subr.bf16.mxu1 %v493_v0 }
  0x1b   :  { %445 = vmatpush3.bf16.msra.mxu0 %v482_v13 }
  0x1c   :  { %446 = vmatprep.subr.bf16.mxu0 %v493_v0 }
  0x1d   :  { %465 = vmatpush3.bf16.msra.mxu1 %v490_v21 }
  0x1e   :  { %466 = vmatprep.subr.bf16.mxu1 %v493_v0 }
  0x1f   :  { %447 = vmatpush3.bf16.msra.mxu0 %v483_v14 }
  0x20   :  { %448 = vmatprep.subr.bf16.mxu0 %v493_v0 }
  0x21   :  { %467 = vmatpush3.bf16.msra.mxu1 %v491_v35 }
  0x22   :  { %468 = vmatprep.subr.bf16.mxu1 %v493_v0 }
  0x23   :  { %449 = vmatpush3.bf16.msra.mxu0 %v484_v15 }
  0x25   :  { %469 = vmatpush3.bf16.msra.mxu1 %v492_v36 }
  0xd9   :  { %v82_v22 = vpop.f32.mrb[0].mxu0 }
  0xda   :  { %v426_v23 = vpop.f32.mrb[1].mxu0  ;;  %v132_v24 = vpop.f32.mrb[0].mxu1 }
  0xdb   :  { %v133_v26 = vadd.f32 %v132_v24, %v82_v22  ;;  %v85_v27 = vpop.f32.mrb[2].mxu0  ;;  %v432_v28 = vpop.f32.mrb[1].mxu1 }
  0xdc   :  { %v427_v29 = vpop.f32.mrb[3].mxu0  ;;  %v135_v30 = vpop.f32.mrb[2].mxu1 }
  0xdd   :  { %v145_v31 = vadd.f32 %v381_v25, %v133_v26  ;;  %v433_v32 = vpop.f32.mrb[3].mxu1 }
  0xdf   :  { %v146_v33 = vmax.f32 %v145_v31, 0.0 }
  0xe1   :  { %v147_v34 = vpack.c.bf16 %v146_v33, %v146_v33 }
  0xe3   :  { %451 = vmatmul.mubr.bf16.vlgmr.msra.gmra.mrb[4].mxu0 %v147_v34 }
 0x1b6   :  { %v253_v38 = vpop.f32.mrb[4].mxu0 }
 0x1b7   :  { %v254_v39 = vadd.f32 %v382_v37, %v253_v38  ;;  %v452_v40 = vpop.f32.mrb[5].mxu0 }
 0x1b8   :  { %v256_v41 = vpop.f32.mrb[6].mxu0 }
 0x1b9   :  { %v259_v42 = vmax.f32 %v254_v39, 0.0  ;;  %v453_v43 = vpop.f32.mrb[7].mxu0 }
 0x1bb   :  { %v260_v44 = vpack.c.bf16 %v259_v42, %v259_v42 }
 0x1bd   :  { %471 = vmatmul.mubr.bf16.vlgmr.msra.gmra.mrb[4].mxu1 %v260_v44 }
 0x290   :  { %v366_v46 = vpop.f32.mrb[4].mxu1 }
 0x291   :  { %v367_v47 = vadd.f32 %v391_v45, %v366_v46  ;;  %v472_v48 = vpop.f32.mrb[5].mxu1 }
 0x292   :  { %v369_v49 = vpop.f32.mrb[6].mxu1 }
 0x293   :  { %373 = vst.msk [vmem:[%s652_s9] sm:$0xff] %vm372_vm4, %v367_v47  ;;  %v473_v50 = vpop.f32.mrb[7].mxu1 }

</bundles_post_ra>
